<compile_context>
chip_gen: v7x
topology: tpu7x:2x2x1
jax: 0.10.0
libtpu: 0.0.40
codegen_flags: <defaults>
</compile_context>

<pallas_src>
import math
from functools import partial

import jax
import jax.numpy as jnp
from jax.experimental import pallas as pl
from jax.experimental.pallas import tpu as pltpu


# -----------------------------------------------------------------------------
# Kernels
# -----------------------------------------------------------------------------
def _bn_resident_kernel(x_ref, w_ref, b_ref, o_ref, *, eps, inv_n, native_apply):
    # One (Bg, C, T) group resident in VMEM.  Single streaming pass:
    # f32 sum / sumsq -> per-channel scale/shift -> one FMA per element.
    x32 = x_ref[...].astype(jnp.float32)
    s = jnp.sum(x32, axis=(0, 2))[:, None]            # (C, 1), sublane-major
    sq = jnp.sum(x32 * x32, axis=(0, 2))[:, None]     # (C, 1)
    mean = s * inv_n
    var = jnp.maximum(sq * inv_n - mean * mean, 0.0)  # unbiased=False
    inv_std = jax.lax.rsqrt(var + eps)                # EUP
    scale = w_ref[...] * inv_std                      # (C, 1)
    shift = b_ref[...] - mean * scale
    if native_apply and o_ref.dtype != jnp.float32:
        # bf16-native FMA (v6e/v7x): packed vregs, no per-element casts.
        o_ref[...] = (x_ref[...] * scale[None].astype(o_ref.dtype)
                      + shift[None].astype(o_ref.dtype))
    else:
        o_ref[...] = (x32 * scale[None] + shift[None]).astype(o_ref.dtype)


def _bn_stats_kernel(x_ref, sum_ref, sq_ref):
    # Accumulate per-channel sum / sum-of-squares in f32 across (Bg, T) tiles.
    # Accumulators are resident across the two reduction grid axes and kept in
    # the natural (C, 1) reduction layout (no per-tile lane relayout).
    first = (pl.program_id(1) == 0) & (pl.program_id(2) == 0)

    @pl.when(first)
    def _():
        sum_ref[...] = jnp.zeros_like(sum_ref)
        sq_ref[...] = jnp.zeros_like(sq_ref)

    x32 = x_ref[...].astype(jnp.float32)
    # TODO(synk): on v7x consider pushing these reductions to the idle MXU
    # (dot with an all-ones vector) to free VALU slots.
    sum_ref[...] += jnp.sum(x32, axis=(0, 2))[:, None]
    sq_ref[...] += jnp.sum(x32 * x32, axis=(0, 2))[:, None]


def _bn_apply_kernel(x_ref, scale_ref, shift_ref, o_ref, *, upcast):
    # Lane-dense elementwise apply: one FMA per element.
    scale = scale_ref[...][None]   # (1, C, 1)
    shift = shift_ref[...][None]
    if upcast:
        o_ref[...] = (x_ref[...].astype(jnp.float32) * scale + shift).astype(o_ref.dtype)
    else:
        o_ref[...] = x_ref[...] * scale + shift


# -----------------------------------------------------------------------------
# Wrapper / path selection
# -----------------------------------------------------------------------------
def _default_vmem_budget() -> int:
    # Conservative default = v7x physical VMEM per TensorCore; query the real
    # capacity when available (v5e/v6e: 128 MiB).
    cap = 64 << 20
    try:
        info = pltpu.get_tpu_info()
        cap = int(getattr(info, "vmem_capacity_bytes", cap))
    except Exception:
        pass
    return (cap * 3) // 4  # headroom for compiler-internal scratch


def _native_bf16_vpu() -> bool:
    # v6e / v7x have bf16 VALUs; v5e (and older) do not -> keep f32 math there.
    try:
        kind = jax.devices()[0].device_kind.lower()
    except Exception:
        return False
    return not any(tag in kind for tag in ("v2", "v3", "v4", "v5"))


def _tile_bytes(bg, C, t, itemsize):
    # in + out double-buffered + f32 working copy of the tile.
    return 4 * bg * C * t * itemsize + 2 * bg * C * t * 4


def _pick_tile(Bg, C, T, itemsize, budget):
    """Pick (bg_tile, t_tile) for the tiled path.

    Prefers full-T blocks (lane-dense, unmasked stores) with Bg tiling;
    otherwise the largest 128-multiple T divisor that fits.  Always returns a
    usable tile (best effort) so arbitrary T never falls back to an oversized
    resident block.
    """
    t_cands = [T]
    m = (T // 128) * 128
    while m >= 128:
        if m < T and T % m == 0:
            t_cands.append(m)
        m -= 128
    bg_cands = [d for d in range(Bg, 0, -1) if Bg % d == 0]

    for t in t_cands:                      # largest t first (lane-dense)
        for bg in bg_cands:                # then largest bg that fits
            if _tile_bytes(bg, C, t, itemsize) <= budget:
                return bg, t
    # Nothing satisfies the stated budget: smallest tile, best effort.
    return 1, t_cands[-1]


def _bn_resident(xg, w2, b2, *, eps, vmem_limit, native_apply, single_buffer):
    G, Bg, C, T = xg.shape
    spec_kwargs = {}
    if single_buffer:
        # v7x-style 64 MiB VMEM: drop double-buffering on the big group blocks
        # so the 1-read/1-write path still fits.
        spec_kwargs = dict(pipeline_mode=pl.Buffered(1))

    def big_spec():
        return pl.BlockSpec((pl.Squeezed(), Bg, C, T), lambda g: (g, 0, 0, 0),
                            **spec_kwargs)

    n_elems = G * Bg * C * T
    return pl.pallas_call(
        partial(_bn_resident_kernel, eps=eps, inv_n=1.0 / float(Bg * T),
                native_apply=native_apply),
        out_shape=jax.ShapeDtypeStruct((G, Bg, C, T), xg.dtype),
        grid_spec=pltpu.PrefetchScalarGridSpec(
            num_scalar_prefetch=0,
            grid=(G,),
            in_specs=[
                big_spec(),
                pl.BlockSpec((C, 1), lambda g: (0, 0)),
                pl.BlockSpec((C, 1), lambda g: (0, 0)),
            ],
            out_specs=big_spec(),
        ),
        compiler_params=pltpu.CompilerParams(
            dimension_semantics=("parallel",),
            vmem_limit_bytes=int(vmem_limit),
        ),
        cost_estimate=pl.CostEstimate(
            flops=5 * n_elems,
            transcendentals=G * C,
            bytes_accessed=2 * n_elems * int(xg.dtype.itemsize) + 2 * C * 4,
        ),
    )(xg, w2, b2)


def _bn_tiled(xg, weight, bias, *, eps, bg_tile, t_tile, vmem_limit, native_apply):
    G, Bg, C, T = xg.shape
    n_bg = Bg // bg_tile
    n_t = T // t_tile
    itemsize = int(xg.dtype.itemsize)
    n_elems = G * Bg * C * T

    # Pass 1: per-(group, channel) sum / sumsq (f32, (C,1) sublane layout),
    # resident across the (Bg, T) reduction grid axes.
    sums, sqs = pl.pallas_call(
        _bn_stats_kernel,
        out_shape=(
            jax.ShapeDtypeStruct((G, C, 1), jnp.float32),
            jax.ShapeDtypeStruct((G, C, 1), jnp.float32),
        ),
        grid_spec=pltpu.PrefetchScalarGridSpec(
            num_scalar_prefetch=0,
            grid=(G, n_bg, n_t),
            in_specs=[
                pl.BlockSpec((pl.Squeezed(), bg_tile, C, t_tile),
                             lambda g, i, t: (g, i, 0, t)),
            ],
            out_specs=[
                pl.BlockSpec((pl.Squeezed(), C, 1), lambda g, i, t: (g, 0, 0)),
                pl.BlockSpec((pl.Squeezed(), C, 1), lambda g, i, t: (g, 0, 0)),
            ],
        ),
        compiler_params=pltpu.CompilerParams(
            dimension_semantics=("parallel", "arbitrary", "arbitrary"),
            vmem_limit_bytes=int(vmem_limit),
        ),
        cost_estimate=pl.CostEstimate(
            flops=3 * n_elems,
            transcendentals=0,
            bytes_accessed=n_elems * itemsize + 2 * G * C * 4,
        ),
    )(xg)
    # TODO(synk): with G == 1 on v7x, split the stats pass over the 2
    # TensorCores (partial sums per Bg half + tiny combine) to avoid idling one.

    # Finalize (G*C elements -- trivially cheap in plain JAX): fold weight/bias
    # into per-channel scale/shift.  Same formula as the resident path.
    inv_n = 1.0 / float(Bg * T)
    mean = sums * inv_n
    var = jnp.maximum(sqs * inv_n - mean * mean, 0.0)
    inv_std = jax.lax.rsqrt(var + eps)
    scale = weight.reshape(1, C, 1) * inv_std          # (G, C, 1) f32
    shift = bias.reshape(1, C, 1) - mean * scale
    if native_apply and xg.dtype != jnp.float32:
        scale = scale.astype(xg.dtype)                 # bf16-native apply
        shift = shift.astype(xg.dtype)
        upcast = False
    else:
        upcast = xg.dtype != jnp.float32               # e.g. bf16 on v5e

    # Pass 2: lane-dense elementwise apply; every (g, i, t) tile independent.
    out = pl.pallas_call(
        partial(_bn_apply_kernel, upcast=upcast),
        out_shape=jax.ShapeDtypeStruct((G, Bg, C, T), xg.dtype),
        grid_spec=pltpu.PrefetchScalarGridSpec(
            num_scalar_prefetch=0,
            grid=(G, n_bg, n_t),
            in_specs=[
                pl.BlockSpec((pl.Squeezed(), bg_tile, C, t_tile),
                             lambda g, i, t: (g, i, 0, t)),
                pl.BlockSpec((pl.Squeezed(), C, 1), lambda g, i, t: (g, 0, 0)),
                pl.BlockSpec((pl.Squeezed(), C, 1), lambda g, i, t: (g, 0, 0)),
            ],
            out_specs=pl.BlockSpec((pl.Squeezed(), bg_tile, C, t_tile),
                                   lambda g, i, t: (g, i, 0, t)),
        ),
        compiler_params=pltpu.CompilerParams(
            dimension_semantics=("parallel", "parallel", "parallel"),
            vmem_limit_bytes=int(vmem_limit),
        ),
        cost_estimate=pl.CostEstimate(
            flops=2 * n_elems,
            transcendentals=0,
            bytes_accessed=2 * n_elems * itemsize,
        ),
    )(xg, scale, shift)
    return out


def batch_norm_local(x, weight, bias, *, virtual_bs: int = 8, eps: float = 1e-5,
                     vmem_budget_bytes=None):
    B, C, T = x.shape
    G = int(math.ceil(B / virtual_bs))
    assert B % G == 0, "x.view(G, -1, C, T) requires B divisible by G"
    Bg = B // G
    xg = x.reshape(G, Bg, C, T)
    # (C, 1) sublane layout matches the natural per-channel reduction output.
    w = weight.reshape(C, 1).astype(jnp.float32)
    b = bias.reshape(C, 1).astype(jnp.float32)

    budget = _default_vmem_budget() if vmem_budget_bytes is None else int(vmem_budget_bytes)
    itemsize = jnp.dtype(x.dtype).itemsize
    native_apply = (x.dtype == jnp.float32) or _native_bf16_vpu()

    x_bytes = Bg * C * T * itemsize
    f32_work = Bg * C * T * 4                 # conservative f32 working copy
    resident_db = 4 * x_bytes + f32_work      # double-buffered in+out
    resident_sb = 2 * x_bytes + f32_work      # single-buffered (pl.Buffered(1))

    out = None
    if resident_db <= budget:
        out = _bn_resident(
            xg, w, b, eps=eps,
            vmem_limit=max(32 << 20, resident_db + (4 << 20)),
            native_apply=native_apply, single_buffer=False)
    elif resident_sb <= budget and hasattr(pl, "Buffered"):
        # Keep the bandwidth-optimal 1-read/1-write path (v7x, 64 MiB VMEM) by
        # single-buffering the big blocks; fall back to the tiled path if this
        # jax build rejects pipeline_mode / buffer_count=1.
        try:
            out = _bn_resident(
                xg, w, b, eps=eps,
                vmem_limit=max(32 << 20, resident_sb + (4 << 20)),
                native_apply=native_apply, single_buffer=True)
        except Exception:
            out = None

    if out is None:
        bg_tile, t_tile = _pick_tile(Bg, C, T, itemsize, budget)
        tile_need = _tile_bytes(bg_tile, C, t_tile, itemsize)
        out = _bn_tiled(
            xg, weight.astype(jnp.float32), bias.astype(jnp.float32),
            eps=eps, bg_tile=bg_tile, t_tile=t_tile,
            vmem_limit=max(32 << 20, tile_need + (8 << 20)),
            native_apply=native_apply)

    return out.reshape(B, C, T)


# -----------------------------------------------------------------------------
# Test
# -----------------------------------------------------------------------------
def _reference(x, weight, bias, virtual_bs, eps):
    B, C, T = x.shape
    G = int(math.ceil(B / virtual_bs))
    xg = x.reshape(G, -1, C, T)
    mean = xg.mean(axis=(1, 3), keepdims=True)
    var = ((xg - mean) ** 2).mean(axis=(1, 3), keepdims=True)
    y = (xg - mean) / jnp.sqrt(var + eps)
    y = y * weight[None, None, :, None] + bias[None, None, :, None]
    return y.reshape(B, C, T)


if __name__ == "__main__":
    virtual_bs, eps = 8, 1e-5
    key = jax.random.PRNGKey(0)

    # 1) Small shape -> group-resident single-pass path.
    B, C, T = 16, 4, 16
    x = jax.random.normal(key, (B, C, T), dtype=jnp.float32)
    weight = 1.0 + 0.1 * jnp.arange(C, dtype=jnp.float32)
    bias = 0.05 * jnp.arange(C, dtype=jnp.float32)

    out = jax.block_until_ready(
        batch_norm_local(x, weight, bias, virtual_bs=virtual_bs, eps=eps))
    ref = _reference(x, weight, bias, virtual_bs, eps)
    assert out.shape == (B, C, T)
    assert jnp.allclose(out, ref, atol=3e-5, rtol=3e-5), "resident path mismatch"

    # 2) Forced tiny VMEM budget -> two-pass (Bg, T)-tiled path (the path used
    #    for realistic / v7x-sized discriminator activations).
    B2, C2, T2 = 16, 8, 256
    x2 = jax.random.normal(jax.random.PRNGKey(0), (B2, C2, T2), dtype=jnp.float32)
    w2 = 1.0 + 0.1 * jnp.arange(C2, dtype=jnp.float32)
    b2 = 0.05 * jnp.arange(C2, dtype=jnp.float32)

    out2 = jax.block_until_ready(
        batch_norm_local(x2, w2, b2, virtual_bs=virtual_bs, eps=eps,
                         vmem_budget_bytes=0))
    ref2 = _reference(x2, w2, b2, virtual_bs, eps)
    assert jnp.allclose(out2, ref2, atol=1e-4, rtol=1e-4), "tiled path mismatch"

    print("KERNEL_OK")
</pallas_src>

<mosaic_0001>
module attributes {stable_mosaic.version = 11 : i64} {
  func.func @_bn_resident_kernel(%arg0: i32, %arg1: memref<1x8x4x16xf32, #tpu.memory_space<vmem>>, %arg2: memref<4x1xf32, #tpu.memory_space<vmem>>, %arg3: memref<4x1xf32, #tpu.memory_space<vmem>>, %arg4: memref<1x8x4x16xf32, #tpu.memory_space<vmem>>) attributes {dimension_semantics = [#tpu.dimension_semantics<parallel>], iteration_bounds = array<i64: 2>, scalar_prefetch = 0 : i64, scratch_operands = 0 : i64, tpu.core_type = #tpu.core_type<tc>, window_params = [{transform_indices = @transform_0, window_bounds = array<i64: 1, 8, 4, 16>}, {pipeline_mode = #tpu.pipeline_mode<synchronous>, transform_indices = @transform_1, window_bounds = array<i64: 4, 1>}, {pipeline_mode = #tpu.pipeline_mode<synchronous>, transform_indices = @transform_2, window_bounds = array<i64: 4, 1>}, {transform_indices = @transform_3, window_bounds = array<i64: 1, 8, 4, 16>}]} {
    %c0 = arith.constant 0 : index
    %c0_0 = arith.constant 0 : index
    %c0_1 = arith.constant 0 : index
    %c0_2 = arith.constant 0 : index
    %0 = vector.load %arg1[%c0, %c0_0, %c0_1, %c0_2] : memref<1x8x4x16xf32, #tpu.memory_space<vmem>>, vector<1x8x4x16xf32>
    %1 = vector.shape_cast %0 : vector<1x8x4x16xf32> to vector<8x4x16xf32>
    %cst = arith.constant dense<0.000000e+00> : vector<4xf32>
    %2 = vector.multi_reduction <add>, %1, %cst [0, 2] : vector<8x4x16xf32> to vector<4xf32>
    %3 = vector.shape_cast %2 : vector<4xf32> to vector<4x1xf32>
    %4 = arith.mulf %1, %1 : vector<8x4x16xf32>
    %cst_3 = arith.constant dense<0.000000e+00> : vector<4xf32>
    %5 = vector.multi_reduction <add>, %4, %cst_3 [0, 2] : vector<8x4x16xf32> to vector<4xf32>
    %6 = vector.shape_cast %5 : vector<4xf32> to vector<4x1xf32>
    %cst_4 = arith.constant 7.812500e-03 : f32
    %7 = vector.broadcast %cst_4 : f32 to vector<4x1xf32>
    %8 = arith.mulf %3, %7 : vector<4x1xf32>
    %cst_5 = arith.constant 7.812500e-03 : f32
    %9 = vector.broadcast %cst_5 : f32 to vector<4x1xf32>
    %10 = arith.mulf %6, %9 : vector<4x1xf32>
    %11 = arith.mulf %8, %8 : vector<4x1xf32>
    %12 = arith.subf %10, %11 : vector<4x1xf32>
    %cst_6 = arith.constant 0.000000e+00 : f32
    %13 = vector.broadcast %cst_6 : f32 to vector<4x1xf32>
    %14 = arith.maximumf %12, %13 : vector<4x1xf32>
    %cst_7 = arith.constant 9.99999974E-6 : f32
    %15 = vector.broadcast %cst_7 : f32 to vector<4x1xf32>
    %16 = arith.addf %14, %15 : vector<4x1xf32>
    %17 = math.rsqrt %16 : vector<4x1xf32>
    %c0_8 = arith.constant 0 : index
    %c0_9 = arith.constant 0 : index
    %18 = vector.load %arg2[%c0_8, %c0_9] : memref<4x1xf32, #tpu.memory_space<vmem>>, vector<4x1xf32>
    %19 = arith.mulf %18, %17 : vector<4x1xf32>
    %c0_10 = arith.constant 0 : index
    %c0_11 = arith.constant 0 : index
    %20 = vector.load %arg3[%c0_10, %c0_11] : memref<4x1xf32, #tpu.memory_space<vmem>>, vector<4x1xf32>
    %21 = arith.mulf %8, %19 : vector<4x1xf32>
    %22 = arith.subf %20, %21 : vector<4x1xf32>
    %23 = vector.shape_cast %19 : vector<4x1xf32> to vector<1x4x1xf32>
    %24 = vector.broadcast %23 : vector<1x4x1xf32> to vector<8x4x16xf32>
    %25 = arith.mulf %1, %24 : vector<8x4x16xf32>
    %26 = vector.shape_cast %22 : vector<4x1xf32> to vector<1x4x1xf32>
    %27 = vector.broadcast %26 : vector<1x4x1xf32> to vector<8x4x16xf32>
    %28 = arith.addf %25, %27 : vector<8x4x16xf32>
    %c0_12 = arith.constant 0 : index
    %c0_13 = arith.constant 0 : index
    %c0_14 = arith.constant 0 : index
    %c0_15 = arith.constant 0 : index
    %29 = vector.load %arg4[%c0_12, %c0_13, %c0_14, %c0_15] : memref<1x8x4x16xf32, #tpu.memory_space<vmem>>, vector<1x8x4x16xf32>
    %30 = vector.shape_cast %29 : vector<1x8x4x16xf32> to vector<8x4x16xf32>
    %31 = vector.shape_cast %28 : vector<8x4x16xf32> to vector<1x8x4x16xf32>
    tpu.vector_store %arg4[%c0_12, %c0_13, %c0_14, %c0_15], %31 {strides = array<i32>} : memref<1x8x4x16xf32, #tpu.memory_space<vmem>>, vector<1x8x4x16xf32>,
    return
  }
  func.func @transform_0(%arg0: i32) -> (i32, i32, i32, i32) {
    %c0_i32 = arith.constant 0 : i32
    %c0_i32_0 = arith.constant 0 : i32
    %c0_i32_1 = arith.constant 0 : i32
    %c0_i32_2 = arith.constant 0 : i32
    return %arg0, %c0_i32, %c0_i32_0, %c0_i32_1 : i32, i32, i32, i32
  }
  func.func @transform_1(%arg0: i32) -> (i32, i32) {
    %c0_i32 = arith.constant 0 : i32
    %c0_i32_0 = arith.constant 0 : i32
    %c0_i32_1 = arith.constant 0 : i32
    return %c0_i32, %c0_i32_0 : i32, i32
  }
  func.func @transform_2(%arg0: i32) -> (i32, i32) {
    %c0_i32 = arith.constant 0 : i32
    %c0_i32_0 = arith.constant 0 : i32
    %c0_i32_1 = arith.constant 0 : i32
    return %c0_i32, %c0_i32_0 : i32, i32
  }
  func.func @transform_3(%arg0: i32) -> (i32, i32, i32, i32) {
    %c0_i32 = arith.constant 0 : i32
    %c0_i32_0 = arith.constant 0 : i32
    %c0_i32_1 = arith.constant 0 : i32
    %c0_i32_2 = arith.constant 0 : i32
    return %arg0, %c0_i32, %c0_i32_0, %c0_i32_1 : i32, i32, i32, i32
  }
}

</mosaic_0001>

<bundles_post_ra>
// kernel: tpu_custom_call.1
= control target key start
LH: loop header
LB: loop body
LE: loop exit
PB: predicated region body
PF: predicated region fallthrough
CT: control target
= control target key end

     0   :  { %8 = vsyncpa [#allocation3], 0  ;;  %s811_s0 = inlined_call_operand.hbm [shape: f32[2,8,4,16], index: 0, kind: input, shape index: {}]   ;;  %s812_s1 = inlined_call_operand.vmem [shape: f32[4,1], index: 1, kind: input, shape index: {}]   ;;  %s813_s2 = inlined_call_operand.vmem [shape: f32[4,1], index: 2, kind: input, shape index: {}]   ;;  %s814_s3 = inlined_call_operand.hbm [shape: f32[2,8,4,16], index: 3, kind: output, shape index: {}]  }
   0x1   :  { %10 = vsyncpa [#allocation3 + $0x1], 0 }
   0x2   :  { %11 = vsyncpa [#allocation4], 0 }
   0x3   :  { %13 = vsyncpa [#allocation4 + $0x1], 0  ;;  %s569_s12 = smov 0   ;;  %s571_s13 = smov 0  }
   0x4   :  { %s573_s14 = smov 0   ;;  %s575_s15 = smov 0  }
   0x5 LB: > { %s590_s16 = sadd.s32 4294967295, %s540_s15   ;;  %s373_s17 = sadd.s32 4294967294, %s540_s15   ;;  %s540_s15 = sphi %s575_s15, %s827_s15   ;;  %s536_s14 = sphi %s573_s14, %s826_s14   ;;  %s532_s13 = sphi %s571_s13, %s825_s13   ;;  %s528_s12 = sphi %s569_s12, %s824_s12  }
   0x6   : > { %s594_s18 = sadd.s32 1, %s540_s15   ;;  %s26_s19 = sadd.s32 1, %s536_s14 }
   0x7   : > { %s23_s20 = ssub.s32 %s540_s15, %s594_s18  ;;  %p33_p0 = scmp.ne.s32.totalorder %s536_s14, %s532_s13 }
   0x8   : > { %p24_p1 = scmp.eq.s32.totalorder %s23_s20, 0  ;;  %p34_p2 = scmp.eq.s32.totalorder %s540_s15, 0 }
   0x9   : > { %p39_p3 = scmp.ne.s32.totalorder %s532_s13, %s528_s12  ;;  %p40_p4 = scmp.eq.s32.totalorder %s590_s16, 0 }
   0xa   : > { %s606_s21 = scalar_select %p24_p1, %s536_s14, %s26_s19  }
   0xb   : > { %p608_p5 = por %p34_p2, %p33_p0  ;;  %p612_p6 = por %p40_p4, %p39_p3 }
   0xc   : > { %p105_p7 = scmp.eq.s32.totalorder %s590_s16, 1  ;;  %p111_p8 = scmp.eq.s32.totalorder %s373_s17, 1 }
   0xd   : > { %p401_p10 = scmp.lt.s32.totalorder %s540_s15, 2  ;;  %s137_s26 = sand.u32 1, %s536_s14  }
   0xe   : > { %p619_p11 = por %p105_p7, %p33_p0  ;;  %p623_p12 = por %p111_p8, %p39_p3 }
   0xf   : > { %s387_s27 = sshll.u32 %s540_s15, 9  ;;  %s376_s28 = sshll.u32 %s137_s26, 5 }
  0x10   : > { %s818_s24 = scalar_select %p619_p11, 1, 0 }
  0x11   : > { %s819_s25 = scalar_select %p623_p12, 1, 0 }
  0x12   : > { %s632_s4 = scalar_lea.hbm %s811_s0, %s387_s27  ;;  %s141_s5 = scalar_lea.vmem [#allocation2], %s376_s28 }
  0x13   : > { %s148_s6 = sshll.u32 %s141_s5, 4  ;;  %p636_p13 = pnand %p401_p10, %p608_p5  ;;  %s640_s6 = int_to_ptr.vmem [resolvable:$true] %s148_s6 }
  0x14   : > { %s642_s8 = scalar_lea.sflag [#allocation3], %s137_s26  ;;  %s444_s9 = scalar_lea.hbm %s632_s4, 512 }
  0x15   : > { %p445_p0 = scmp.ne.s32.totalorder %s632_s4, %s444_s9  ;;  %p446_p1 = pneg %p636_p13 }
  0x16   : > { %s449_s17 = scalar_lea.hbm %s811_s0, 1024  ;;  %p450_p4 = scmp.lt.u32.totalorder %s632_s4, %s811_s0 }
  0x17   : > { %p447_p2 = pnand %p446_p1, %p445_p0  ;;  %p451_p5 = scmp.lt.u32.totalorder %s449_s17, %s444_s9 }
  0x18   : > { %p453_p8 = scmp.lt.u32.totalorder %s444_s9, %s632_s4 }
  0x19   : > { %p448_p3 = pneg %p447_p2  ;;  %p452_p7 = por %p451_p5, %p450_p4 }
  0x1b   : > { %p454_p10 = por %p453_p8, %p452_p7 }
  0x1d   : > { %p455_p9 = pnand %p454_p10, %p448_p3 }
  0x1f   : > { %458 = shalt.err (!%p455_p9)
}
  0x20   : > { %s459_s22 = scalar_lea.vmem %s640_s6, 512  ;;  %s542_s26 = smov [#allocation2]  }
  0x21   : > { %p460_p0 = scmp.ne.s32.totalorder %s640_s6, %s459_s22  ;;  %s464_s27 = sshll.u32 %s542_s26, 4  ;;  %s465_s27 = int_to_ptr.vmem [resolvable:$false] %s464_s27 }
  0x22   : > { %s466_s28 = scalar_lea.vmem %s465_s27, 1024  ;;  %p467_p11 = scmp.lt.s32.totalorder %s640_s6, %s465_s27 }
  0x23   : > { %p462_p2 = pnand %p460_p0, %p446_p1  ;;  %p468_p4 = scmp.lt.s32.totalorder %s466_s28, %s459_s22 }
  0x25   : > { %p463_p12 = pneg %p462_p2  ;;  %p469_p5 = por %p468_p4, %p467_p11 }
  0x27   : > { %p470_p7 = pnand %p469_p5, %p463_p12 }
  0x29   : > { %473 = shalt.err (!%p470_p7)
}
  0x2a   : > { %s543_s29 = smov 64   ;;  %s544_s30 = smov 4  }
  0x2b   : > { %396 = dma.hbm_to_vmem [thread:$0]  (!%p636_p13), %s632_s4, 512, %s640_s6, %s642_s8, %s543_s29, %s543_s29, %s544_s30  }
  0x2c   : > { %p379_p9 = scmp.ge.s32.totalorder %s540_s15, 1  ;;  %p156_p1 = scmp.lt.s32.totalorder %s540_s15, 3 }
  0x2e   : > { %p157_p3 = pnand %p379_p9, %p156_p1 }
  0x2f   : > { %s673_s5 = sand.u32 (!%p157_p3), 1, %s532_s13  }
  0x30   : > { %160 = sbr.rel (%p157_p3) target bundleno = 391 (0x187), region = 32  ;;  %s380_s9 = sshll.u32 (!%p157_p3), %s673_s5, 5 }
  0x31   : > { %s163_s10 = scalar_lea.sflag (!%p157_p3), [#allocation3], %s673_s5  ;;  %s679_s11 = scalar_lea.vmem (!%p157_p3), [#allocation2], %s380_s9 }
  0x37   : > { %519 = dma.done.wait (%p612_p6), %s163_s10, 512  }
  0x38   : > { %521 = vsyncadd (%p612_p6), %s163_s10, 4294966784  ;;  %vm197_vm0 = vcmask 125952   ;;  %v686_v0 = vld [vmem:[%s679_s11] sm:$0xf]  ;;  %v689_v1 = vld [vmem:[%s679_s11 + $0x4] sm:$0xf] }
  0x39   : > { %v692_v2 = vld [vmem:[%s679_s11 + $0x8] sm:$0xf]  ;;  %v695_v3 = vld [vmem:[%s679_s11 + $0xc] sm:$0xf]  ;;  %v215_v4 = vmul.f32 %v686_v0, %v686_v0  ;;  %v198_v5 = vsel %vm197_vm0, %v686_v0, 0.0  ;;  %v199_v6 = vsel %vm197_vm0, %v689_v1, 0.0  ;;  %v216_v7 = vmul.f32 %v689_v1, %v689_v1 }
  0x3a   : > { %v217_v8 = vmul.f32 %v692_v2, %v692_v2  ;;  %v708_v9 = vld [vmem:[%s679_s11 + $0x10] sm:$0xf]  ;;  %v200_v10 = vadd.f32 %v199_v6, %v198_v5  ;;  %v201_v11 = vsel %vm197_vm0, %v692_v2, 0.0  ;;  %v203_v12 = vsel %vm197_vm0, %v695_v3, 0.0  ;;  %v717_v14 = vld [vmem:[%s679_s11 + $0x14] sm:$0xf] }
  0x3b   : > { %v218_v13 = vmul.f32 %v695_v3, %v695_v3  ;;  %v223_v16 = vsel %vm197_vm0, %v215_v4, 0.0  ;;  %v205_v17 = vsel %vm197_vm0, %v708_v9, 0.0  ;;  %v219_v18 = vmul.f32 %v708_v9, %v708_v9  ;;  %v195_v21 = vld [vmem:[%s679_s11 + $0x18] sm:$0xf]  ;;  %v196_v27 = vld [vmem:[%s679_s11 + $0x1c] sm:$0xf] }
  0x3c   : > { %v202_v15 = vadd.f32 %v201_v11, %v200_v10  ;;  %v224_v19 = vsel %vm197_vm0, %v216_v7, 0.0  ;;  %v226_v20 = vsel %vm197_vm0, %v217_v8, 0.0  ;;  %v207_v24 = vsel %vm197_vm0, %v717_v14, 0.0  ;;  %v247_v55 = vld [vmem:[%s812_s1] sm:$0xf]  ;;  %s388_s8 = sshll.u32 %s590_s16, 9 }
  0x3d   : > { %v225_v23 = vadd.f32 %v224_v19, %v223_v16  ;;  %v220_v25 = vmul.f32 %v717_v14, %v717_v14  ;;  %v228_v26 = vsel %vm197_vm0, %v218_v13, 0.0  ;;  %v209_v30 = vsel %vm197_vm0, %v195_v21, 0.0  ;;  %v249_v58 = vld [vmem:[%s813_s2] sm:$0xf]  ;;  %s188_s17 = scalar_lea.vmem [#allocation5], %s380_s9  ;;  %s757_s22 = scalar_lea.hbm %s814_s3, %s388_s8 }
  0x3e   : > { %v204_v22 = vadd.f32 %v203_v12, %v202_v15  ;;  %v221_v31 = vmul.f32 %v195_v21, %v195_v21  ;;  %v230_v32 = vsel %vm197_vm0, %v219_v18, 0.0  ;;  %v211_v35 = vsel %vm197_vm0, %v196_v27, 0.0  ;;  %s300_s19 = sshll.u32 %s188_s17, 4  ;;  %s287_s26 = scalar_lea.sflag [#allocation4], %s673_s5  ;;  %s759_s19 = int_to_ptr.vmem [resolvable:$true] %s300_s19 }
  0x3f   : > { %v227_v29 = vadd.f32 %v226_v20, %v225_v23  ;;  %v222_v36 = vmul.f32 %v196_v27, %v196_v27  ;;  %v232_v37 = vsel %vm197_vm0, %v220_v25, 0.0  ;;  %v545_v46 = vmov 0   ;;  %s474_s27 = scalar_lea.vmem %s759_s19, 512  ;;  %p821_p11 = scmp.ne.s32.totalorder %s818_s24, 0 }
  0x40   : > { %v206_v28 = vadd.f32 %v205_v17, %v204_v22  ;;  %v234_v40 = vsel %vm197_vm0, %v221_v31, 0.0  ;;  %440 = vset.pattern.permute.xlu1 %v545_v46  ;;  %441 = vset.pattern.permute.xlu0 %v545_v46  ;;  %p475_p6 = scmp.ne.s32.totalorder %s759_s19, %s474_s27  ;;  %s546_s28 = smov [#allocation5]  }
  0x41   : > { %v229_v34 = vadd.f32 %v228_v26, %v227_v29  ;;  %v236_v43 = vsel %vm197_vm0, %v222_v36, 0.0  ;;  %s478_s29 = sshll.u32 %s546_s28, 4  ;;  %s479_s29 = int_to_ptr.vmem [resolvable:$false] %s478_s29 }
  0x42   : > { %v208_v33 = vadd.f32 %v207_v24, %v206_v28  ;;  %p476_p12 = pnand %p475_p6, %p821_p11  ;;  %s480_s30 = scalar_lea.vmem %s479_s29, 1024 }
  0x43   : > { %v231_v39 = vadd.f32 %v230_v32, %v229_v34  ;;  %p481_p8 = scmp.lt.s32.totalorder %s759_s19, %s479_s29  ;;  %p482_p10 = scmp.lt.s32.totalorder %s480_s30, %s474_s27 }
  0x44   : > { %v210_v38 = vadd.f32 %v209_v30, %v208_v33  ;;  %p477_p13 = pneg %p476_p12 }
  0x45   : > { %v233_v42 = vadd.f32 %v232_v37, %v231_v39  ;;  %p483_p0 = por %p482_p10, %p481_p8 }
  0x46   : > { %v212_v41 = vadd.f32 %v211_v35, %v210_v38 }
  0x47   : > { %v235_v44 = vadd.f32 %v234_v40, %v233_v42  ;;  %p484_p2 = pnand %p483_p0, %p477_p13 }
  0x48   : > { %213 = vadd.xlane.f32.xlu0 %v212_v41 }
  0x49   : > { %v237_v45 = vadd.f32 %v236_v43, %v235_v44 }
  0x4c   : > { %238 = vadd.xlane.f32.xlu0 %v237_v45 }
  0xd5   : > { %v214_v47 = vpop.xlane.xlu0 %213 }
  0xd6   : > { %v240_v48 = vmul.f32 0.0078125, %v214_v47 }
  0xd8   : > { %v242_v50 = vmul.f32 %v240_v48, %v240_v48 }
  0xd9   : > { %v239_v49 = vpop.xlane.xlu0 %238 }
  0xda   : > { %v241_v51 = vmul.f32 0.0078125, %v239_v49 }
  0xdc   : > { %v243_v52 = vsub.f32 %v241_v51, %v242_v50 }
  0xde   : > { %v244_v53 = vmax.f32 %v243_v52, 0.0 }
  0xe0   : > { %v245_v54 = vadd.f32 1e-05, %v244_v53 }
  0xe2   : > { %442 = vrsqrt.f32 %v245_v54 }
  0xec   : > { %v443_v56 = vpop.eup %442 }
  0xed   : > { %v248_v57 = vmul.f32 %v443_v56, %v247_v55 }
  0xef   : > { %254 = vperm.xlu1 %440, %v248_v57   ;;  %v250_v59 = vmul.f32 %v248_v57, %v240_v48 }
  0xf1   : > { %v251_v60 = vsub.f32 %v249_v58, %v250_v59 }
  0xf3   : > { %267 = vperm.xlu1 %440, %v251_v60  }
 0x16e   : > { %v255_v61 = vpop.permute.xlu1 %254 }
 0x16f   : > { %v257_v62 = vmul.f32 %v255_v61, %v686_v0  ;;  %v258_v63 = vmul.f32 %v255_v61, %v689_v1  ;;  %v259_v4 = vmul.f32 %v255_v61, %v692_v2  ;;  %v260_v5 = vmul.f32 %v255_v61, %v695_v3 }
 0x170   : > { %v261_v6 = vmul.f32 %v255_v61, %v708_v9  ;;  %v262_v7 = vmul.f32 %v255_v61, %v717_v14  ;;  %v263_v8 = vmul.f32 %v255_v61, %v195_v21  ;;  %v264_v10 = vmul.f32 %v255_v61, %v196_v27 }
 0x172   : > { %v268_v11 = vpop.permute.xlu1 %267 }
 0x173   : > { %v270_v12 = vadd.f32 %v268_v11, %v257_v62  ;;  %v271_v13 = vadd.f32 %v268_v11, %v258_v63  ;;  %v272_v15 = vadd.f32 %v268_v11, %v259_v4  ;;  %v273_v16 = vadd.f32 %v268_v11, %v260_v5 }
 0x174   : > { %v274_v0 = vadd.f32 %v268_v11, %v261_v6  ;;  %v275_v1 = vadd.f32 %v268_v11, %v262_v7  ;;  %v276_v2 = vadd.f32 %v268_v11, %v263_v8  ;;  %v277_v3 = vadd.f32 %v268_v11, %v264_v10 }
 0x175   : > { %278 = vst.msk [vmem:[%s188_s17] sm:$0xf] %vm197_vm0, %v270_v12  ;;  %279 = vst.msk [vmem:[%s188_s17 + $0x4] sm:$0xf] %vm197_vm0, %v271_v13 }
 0x176   : > { %280 = vst.msk [vmem:[%s188_s17 + $0x8] sm:$0xf] %vm197_vm0, %v272_v15  ;;  %281 = vst.msk [vmem:[%s188_s17 + $0xc] sm:$0xf] %vm197_vm0, %v273_v16 }
 0x177   : > { %282 = vst.msk [vmem:[%s188_s17 + $0x10] sm:$0xf] %vm197_vm0, %v274_v0  ;;  %283 = vst.msk [vmem:[%s188_s17 + $0x14] sm:$0xf] %vm197_vm0, %v275_v1 }
 0x178   : > { %284 = vst.msk [vmem:[%s188_s17 + $0x18] sm:$0xf] %vm197_vm0, %v276_v2  ;;  %285 = vst.msk [vmem:[%s188_s17 + $0x1c] sm:$0xf] %vm197_vm0, %v277_v3 }
 0x179   : > { %487 = shalt.err (!%p484_p2)
}
 0x17a   : > { %s488_s9 = scalar_lea.hbm %s757_s22, 512  ;;  %s492_s23 = scalar_lea.hbm %s814_s3, 1024 }
 0x17b   : > { %p489_p4 = scmp.ne.s32.totalorder %s757_s22, %s488_s9  ;;  %p493_p9 = scmp.lt.u32.totalorder %s757_s22, %s814_s3 }
 0x17c   : > { %p494_p1 = scmp.lt.u32.totalorder %s492_s23, %s488_s9  ;;  %p496_p6 = scmp.lt.u32.totalorder %s488_s9, %s757_s22 }
 0x17d   : > { %p490_p5 = pnand %p489_p4, %p821_p11 }
 0x17e   : > { %p495_p3 = por %p494_p1, %p493_p9 }
 0x17f   : > { %p491_p7 = pneg %p490_p5 }
 0x180   : > { %p497_p12 = por %p496_p6, %p495_p3 }
 0x182   : > { %p498_p13 = pnand %p497_p12, %p491_p7 }
 0x184   : > { %501 = shalt.err (!%p498_p13)
}
 0x185   : > { %s547_s7 = smov 64   ;;  %s548_s8 = smov 4  }
 0x186   : > { %391 = dma.vmem_to_hbm [thread:$0]  (%p821_p11), %s759_s19, 512, %s757_s22, %s287_s26, %s547_s7, %s547_s7, %s548_s8  }
 0x187 PF: > { %s315_s17 = sand.u32 1, %s528_s12   ;;  %p822_p8 = scmp.ne.s32.totalorder %s819_s25, 0 }
 0x188   : > { %p823_p10 = scmp.ge.s32.totalorder %s540_s15, 2  ;;  %s316_s16 = scalar_lea.sflag [#allocation4], %s315_s17 }
 0x18a   : > { %p398_p0 = pnand %p823_p10, %p822_p8 }
 0x18c   : > { %523 = dma.done.wait (!%p398_p0), %s316_s16, 512  }
 0x18d   : > { %525 = vsyncadd (!%p398_p0), %s316_s16, 4294966784  ;;  %p16_p2 = scmp.ge.s32.totalorder %s594_s18, 4   ;;  %s824_s12 = smov %s532_s13 }
 0x18e   : > { %s825_s13 = smov %s536_s14  ;;  %s826_s14 = smov %s606_s21 }
 0x18f   : > { %s827_s15 = smov %s594_s18  ;;  %18 = sbr.rel (!%p16_p2) target bundleno = 5 (0x5), region = 77 }
 0x196   :  { %321 = vsyncpa [#allocation3], 1 }
 0x197   :  { %323 = vsyncpa [#allocation3 + $0x1], 1 }
 0x198   :  { %324 = vsyncpa [#allocation4], 1 }
 0x199   :  { %326 = vsyncpa [#allocation4 + $0x1], 1 }

</bundles_post_ra>
